<compile_context>
chip_gen: v5e
topology: v5e:2x2
jax: 0.10.0
libtpu: 0.0.40
codegen_flags: <defaults>
</compile_context>

<pallas_src>
import jax
import jax.numpy as jnp
from jax.experimental import pallas as pl
from jax.experimental.pallas import tpu as pltpu


_LANE = 128            # TPU lane width (last-dim granularity)
_COLS_TARGET = 1024    # lane-dense slab width target (multiple of 128)
_ROWS_PER_TILE = 1024  # 1024 * 1024 * 4 B = 4 MiB per tile per buffer


def _round_up(n, m):
    return ((n + m - 1) // m) * m


def _transformation_kernel(params_ref, x_ref, z_ref, logdet_ref):
    # params (SMEM): [alpha, beta, log|alpha|]
    alpha = params_ref[0]
    beta = params_ref[1]
    log_abs_alpha = params_ref[2]

    x = x_ref[...]                       # f32 [TB, C] tile (VPU elementwise)
    y = alpha * x + beta

    # elu(y): single vselect; exp(y) is the only EUP op in the kernel.
    z_ref[...] = jnp.where(y > 0.0, y, jnp.exp(y) - 1.0)

    # log(|f_deriv(x, alpha)|) == where(x > 0, log|alpha|, x)   (exact identity)
    logdet_ref[...] = jnp.where(x > 0.0, log_abs_alpha, x)


def _choose_cols(n):
    """Pick the slab width. Returns (cols, aligned) where aligned means cols | n."""
    if n % _LANE == 0:
        cols = _COLS_TARGET
        while cols > _LANE and n % cols != 0:
            cols -= _LANE
        return cols, True                 # cols divides n exactly -> zero-copy path
    return min(_COLS_TARGET, _round_up(max(n, 1), _LANE)), False


def transformation_layer_forward(x, alpha, beta):
    """x: f32 array (any shape); alpha, beta: f32 [1].  Returns (z, log_det)."""
    x = x.astype(jnp.float32)
    orig_shape = x.shape
    n = x.size

    # ---- lane-dense slab layout -------------------------------------------
    cols, aligned = _choose_cols(n)
    rows = pl.cdiv(n, cols)

    if aligned:
        # Zero-copy: reshape only (no pad in, no slice out).
        rows_pad = rows
        if rows > _ROWS_PER_TILE:
            tb = _ROWS_PER_TILE            # possible ragged last block: handled by Pallas
        elif rows >= 16 and rows % 16 == 0:
            tb = rows // 2                 # exactly two blocks -> both v7x TensorCores
        else:
            tb = rows                      # single full-extent block
        x_slab = x.reshape(rows_pad, cols)
    else:
        # Ragged fallback: pad input, slice outputs.
        if rows > _ROWS_PER_TILE:
            tb = _ROWS_PER_TILE
            rows_pad = _round_up(rows, tb)
        elif rows >= 16:
            tb = _round_up(pl.cdiv(rows, 2), 8)   # two blocks for v7x
            rows_pad = 2 * tb
        else:
            tb = rows
            rows_pad = rows
        total_pad = rows_pad * cols
        x_slab = jnp.pad(x.reshape(-1), (0, total_pad - n)).reshape(rows_pad, cols)

    total = rows_pad * cols
    num_blocks = pl.cdiv(rows_pad, tb)

    # ---- scalar params (SMEM) ---------------------------------------------
    # Note: alpha == 0 gives log|alpha| = -inf, which is the mathematically
    # correct log-det for x > 0 (matches torch.log(torch.abs(0.*...))).
    log_abs_alpha = jnp.log(jnp.abs(alpha))
    params = jnp.concatenate(
        [alpha.reshape(-1), beta.reshape(-1), log_abs_alpha.reshape(-1)]
    ).astype(jnp.float32)                 # shape (3,)

    z_slab, logdet_slab = pl.pallas_call(
        _transformation_kernel,
        out_shape=(
            jax.ShapeDtypeStruct((rows_pad, cols), jnp.float32),
            jax.ShapeDtypeStruct((rows_pad, cols), jnp.float32),
        ),
        grid=(num_blocks,),
        in_specs=[
            pl.BlockSpec(memory_space=pltpu.MemorySpace.SMEM),   # params (3,)
            pl.BlockSpec((tb, cols), lambda i: (i, 0)),          # x tile
        ],
        out_specs=(
            pl.BlockSpec((tb, cols), lambda i: (i, 0)),          # z tile
            pl.BlockSpec((tb, cols), lambda i: (i, 0)),          # log_det tile
        ),
        compiler_params=pltpu.CompilerParams(
            dimension_semantics=("parallel",),
            vmem_limit_bytes=48 * 1024 * 1024,
        ),
        cost_estimate=pl.CostEstimate(
            flops=5 * total,
            transcendentals=total,
            bytes_accessed=3 * total * 4,
        ),
    )(params, x_slab)

    if aligned:
        z = z_slab.reshape(orig_shape)
        log_det = logdet_slab.reshape(orig_shape)
    else:
        z = z_slab.reshape(-1)[:n].reshape(orig_shape)
        log_det = logdet_slab.reshape(-1)[:n].reshape(orig_shape)
    # torch's .squeeze() on log_det: drop all size-1 dims.
    return z, jnp.squeeze(log_det)


def _reference_forward(x, alpha, beta):
    """Pure-JAX reference mirroring the PyTorch mask formulation."""
    a = alpha[0]
    b = beta[0]
    y = a * x + b
    z = (y > 0) * y + (y <= 0) * (jnp.exp(y) - 1.0)
    deriv = (x > 0) * a + (x <= 0) * jnp.exp(x)
    return z, jnp.squeeze(jnp.log(jnp.abs(deriv)))


if __name__ == "__main__":
    key = jax.random.PRNGKey(0)
    k_x, k_a, k_b = jax.random.split(key, 3)

    # flow1d: batch of 1-D samples (last dim 1, exercises the zero-copy reshape path).
    B, D = 256, 1
    x = jax.random.normal(k_x, (B, D), dtype=jnp.float32)

    # torch.rand(1) -> uniform(0, 1) parameters.
    alpha = jax.random.uniform(k_a, (1,), dtype=jnp.float32)
    beta = jax.random.uniform(k_b, (1,), dtype=jnp.float32)

    z, log_det = transformation_layer_forward(x, alpha, beta)
    jax.block_until_ready((z, log_det))

    z_ref, ld_ref = _reference_forward(x, alpha, beta)
    assert z.shape == z_ref.shape
    assert log_det.shape == ld_ref.shape
    assert jnp.allclose(z, z_ref, atol=1e-5, rtol=1e-5)
    assert jnp.allclose(log_det, ld_ref, atol=1e-5, rtol=1e-5)

    # Also exercise a ragged (non-128-aligned) size to cover the fallback path.
    x2 = jax.random.normal(k_x, (37, 3), dtype=jnp.float32)
    z2, ld2 = transformation_layer_forward(x2, alpha, beta)
    z2_ref, ld2_ref = _reference_forward(x2, alpha, beta)
    assert jnp.allclose(z2, z2_ref, atol=1e-5, rtol=1e-5)
    assert jnp.allclose(ld2, ld2_ref, atol=1e-5, rtol=1e-5)

    print("KERNEL_OK")
</pallas_src>

<mosaic_0001>
module attributes {stable_mosaic.version = 11 : i64} {
  func.func @_transformation_kernel(%arg0: i32, %arg1: memref<3xf32, #tpu.memory_space<smem>>, %arg2: memref<1x256xf32, #tpu.memory_space<vmem>>, %arg3: memref<1x256xf32, #tpu.memory_space<vmem>>, %arg4: memref<1x256xf32, #tpu.memory_space<vmem>>) attributes {dimension_semantics = [#tpu.dimension_semantics<parallel>], iteration_bounds = array<i64: 1>, scalar_prefetch = 0 : i64, scratch_operands = 0 : i64, tpu.core_type = #tpu.core_type<tc>, window_params = [{transform_indices = @transform_0, window_bounds = array<i64: 3>}, {transform_indices = @transform_1, window_bounds = array<i64: 1, 256>}, {transform_indices = @transform_2, window_bounds = array<i64: 1, 256>}, {transform_indices = @transform_3, window_bounds = array<i64: 1, 256>}]} {
    %c0 = arith.constant 0 : index
    %0 = memref.load %arg1[%c0] : memref<3xf32, #tpu.memory_space<smem>>
    %c1 = arith.constant 1 : index
    %1 = memref.load %arg1[%c1] : memref<3xf32, #tpu.memory_space<smem>>
    %c2 = arith.constant 2 : index
    %2 = memref.load %arg1[%c2] : memref<3xf32, #tpu.memory_space<smem>>
    %c0_0 = arith.constant 0 : index
    %c0_1 = arith.constant 0 : index
    %3 = vector.load %arg2[%c0_0, %c0_1] : memref<1x256xf32, #tpu.memory_space<vmem>>, vector<1x256xf32>
    %4 = vector.broadcast %0 : f32 to vector<1x256xf32>
    %5 = arith.mulf %4, %3 : vector<1x256xf32>
    %6 = vector.broadcast %1 : f32 to vector<1x256xf32>
    %7 = arith.addf %5, %6 : vector<1x256xf32>
    %cst = arith.constant 0.000000e+00 : f32
    %8 = vector.broadcast %cst : f32 to vector<1x256xf32>
    %9 = arith.cmpf ogt, %7, %8 : vector<1x256xf32>
    %10 = math.exp %7 : vector<1x256xf32>
    %cst_2 = arith.constant 1.000000e+00 : f32
    %11 = vector.broadcast %cst_2 : f32 to vector<1x256xf32>
    %12 = arith.subf %10, %11 : vector<1x256xf32>
    %13 = arith.select %9, %7, %12 : vector<1x256xi1>, vector<1x256xf32>
    %c0_3 = arith.constant 0 : index
    %c0_4 = arith.constant 0 : index
    %14 = vector.load %arg3[%c0_3, %c0_4] : memref<1x256xf32, #tpu.memory_space<vmem>>, vector<1x256xf32>
    tpu.vector_store %arg3[%c0_3, %c0_4], %13 {strides = array<i32>} : memref<1x256xf32, #tpu.memory_space<vmem>>, vector<1x256xf32>,
    %cst_5 = arith.constant 0.000000e+00 : f32
    %15 = vector.broadcast %cst_5 : f32 to vector<1x256xf32>
    %16 = arith.cmpf ogt, %3, %15 : vector<1x256xf32>
    %17 = vector.broadcast %2 : f32 to vector<1x256xf32>
    %18 = arith.select %16, %17, %3 : vector<1x256xi1>, vector<1x256xf32>
    %c0_6 = arith.constant 0 : index
    %c0_7 = arith.constant 0 : index
    %19 = vector.load %arg4[%c0_6, %c0_7] : memref<1x256xf32, #tpu.memory_space<vmem>>, vector<1x256xf32>
    tpu.vector_store %arg4[%c0_6, %c0_7], %18 {strides = array<i32>} : memref<1x256xf32, #tpu.memory_space<vmem>>, vector<1x256xf32>,
    return
  }
  func.func @transform_0(%arg0: i32) -> i32 {
    %c0_i32 = arith.constant 0 : i32
    %c0_i32_0 = arith.constant 0 : i32
    return %c0_i32 : i32
  }
  func.func @transform_1(%arg0: i32) -> (i32, i32) {
    %c0_i32 = arith.constant 0 : i32
    %c0_i32_0 = arith.constant 0 : i32
    return %arg0, %c0_i32 : i32, i32
  }
  func.func @transform_2(%arg0: i32) -> (i32, i32) {
    %c0_i32 = arith.constant 0 : i32
    %c0_i32_0 = arith.constant 0 : i32
    return %arg0, %c0_i32 : i32, i32
  }
  func.func @transform_3(%arg0: i32) -> (i32, i32) {
    %c0_i32 = arith.constant 0 : i32
    %c0_i32_0 = arith.constant 0 : i32
    return %arg0, %c0_i32 : i32, i32
  }
}

</mosaic_0001>

<bundles_post_ra>
// kernel: tpu_custom_call.1
= control target key start
LH: loop header
LB: loop body
LE: loop exit
PB: predicated region body
PF: predicated region fallthrough
CT: control target
= control target key end

     0   :  { %9 = vsyncpa [#allocation5], 0  ;;  %s243_s0 = inlined_call_operand.hbm [shape: f32[3], index: 0, kind: input, shape index: {}]   ;;  %s244_s1 = inlined_call_operand.hbm [shape: f32[1,256], index: 1, kind: input, shape index: {}]   ;;  %s245_s2 = inlined_call_operand.hbm [shape: f32[1,256], index: 2, kind: output, shape index: {0}]   ;;  %s246_s3 = inlined_call_operand.hbm [shape: f32[1,256], index: 3, kind: output, shape index: {1}]  }
   0x1   :  { %10 = vsyncpa [#allocation3], 0 }
   0x2   :  { %11 = vsyncpa [#allocation4], 0 }
   0x3   :  { %12 = vsyncpa [#allocation9], 0  ;;  %s18_s14 = sshll.u32 %s243_s0, 4  ;;  %s27_s17 = sshll.u32 %s244_s1, 4  ;;  %s19_s14 = int_to_ptr.hbm [resolvable:$true] %s18_s14  ;;  %s28_s17 = int_to_ptr.hbm [resolvable:$true] %s27_s17 }
   0x4   :  { %s199_s18 = smov [#allocation2]   ;;  %s200_s19 = smov [#allocation6]  }
   0x5   :  { %21 = dma.hbm_to_smem %s19_s14, 16, %s199_s18, [#allocation5]  }
   0x6   :  { %s29_s20 = sshll.u32 %s200_s19, 4  ;;  %s30_s20 = int_to_ptr.vmem [resolvable:$true] %s29_s20 }
   0x7   :  { %32 = dma.hbm_to_vmem [thread:$0]  %s28_s17, 32, %s30_s20, [#allocation3]  }
   0x8   :  { %191 = dma.done.wait [#allocation5], 16  }
   0x9   :  { %192 = vsyncadd [#allocation5], 4294967280 }
   0xa   :  { %193 = dma.done.wait [#allocation3], 32  }
   0xb   :  { %194 = vsyncadd [#allocation3], 4294967264 }
   0xc   :  { %41 = sfence }
   0xd   :  { %s42_s21 = sld [smem:[#allocation2]]  ;;  %v55_v0 = vlaneseq  ;;  %v45_v1 = vld [vmem:[#allocation6] sm:$0x3]  ;;  %s201_s23 = smov [#allocation8]  }
   0xe   :  { %s98_s22 = sld [smem:[#allocation2 + $0x1]]  ;;  %s80_s24 = sshll.u32 %s201_s23, 4  ;;  %vm60_vm0 = vcmp.gt.f32.partialorder %v45_v1, 0.0  ;;  %s81_s24 = int_to_ptr.vmem [resolvable:$true] %s80_s24 }
   0xf   :  { %s99_s0 = sld [smem:[#allocation2 + $0x2]]  ;;  %s82_s26 = sshll.u32 %s246_s3, 4  ;;  %vm232_vm1 = vcmp.lt.s32.totalorder %v55_v0, 256  ;;  %s83_s26 = int_to_ptr.hbm [resolvable:$true] %s82_s26 }
  0x10   :  { %s202_s3 = smov [#allocation7]   ;;  %s71_s30 = sshll.u32 %s245_s2, 4  ;;  %s72_s30 = int_to_ptr.hbm [resolvable:$true] %s71_s30 }
  0x11   :  { %s69_s27 = sshll.u32 %s202_s3, 4  ;;  %s70_s27 = int_to_ptr.vmem [resolvable:$true] %s69_s27 }
  0x13   :  { %v46_v2 = vstv %s42_s21 }
  0x14   :  { %v47_v3 = vmul.f32 %v46_v2, %v45_v1  ;;  %v48_v4 = vstv %s98_s22 }
  0x15   :  { %v61_v6 = vstv %s99_s0 }
  0x16   :  { %v49_v7 = vadd.f32 %v48_v4, %v47_v3  ;;  %v62_v8 = vsel %vm60_vm0, %v61_v6, %v45_v1 }
  0x17   :  { %63 = vst.msk [vmem:[#allocation8] sm:$0x3] %vm232_vm1, %v62_v8 }
  0x18   :  { %v51_v9 = vmul.f32 1.442695, %v49_v7  ;;  %85 = dma.vmem_to_hbm [thread:$0]  %s81_s24, 32, %s83_s26, [#allocation9]   ;;  %vm50_vm2 = vcmp.gt.f32.partialorder %v49_v7, 0.0 }
  0x1a   :  { %105 = vpow2.f32 %v51_v9 }
  0x20   :  { %v106_v10 = vpop.eup %105 }
  0x21   :  { %v100_v11 = vadd.f32 -1.0, %v106_v10 }
  0x23   :  { %v54_v12 = vsel %vm50_vm2, %v49_v7, %v100_v11 }
  0x24   :  { %59 = vst.msk [vmem:[#allocation7] sm:$0x3] %vm232_vm1, %v54_v12 }
  0x25   :  { %74 = dma.vmem_to_hbm [thread:$0]  %s70_s27, 32, %s72_s30, [#allocation4]  }
  0x26   :  { %195 = dma.done.wait [#allocation4], 32  }
  0x27   :  { %196 = vsyncadd [#allocation4], 4294967264 }
  0x28   :  { %197 = dma.done.wait [#allocation9], 32  }
  0x29   :  { %198 = vsyncadd [#allocation9], 4294967264 }
  0x2a   :  { %94 = vsyncpa [#allocation3], 1 }
  0x2b   :  { %95 = vsyncpa [#allocation4], 1 }
  0x2c   :  { %96 = vsyncpa [#allocation9], 1 }
  0x2d   :  { %97 = vsyncpa [#allocation5], 1 }

</bundles_post_ra>
